<compile_context>
chip_gen: v5e
topology: v5e:2x2
jax: 0.10.0
libtpu: 0.0.40
codegen_flags: <defaults>
</compile_context>

<pallas_src>
import functools

import jax
import jax.numpy as jnp
from jax import lax
from jax.experimental import pallas as pl
from jax.experimental.pallas import tpu as pltpu


def elastic_arc_kernel(logits_ref, labels_ref, target_ref, out_ref, *, s, tc):
    """out = where(col == label, precomputed_target, x * s)."""
    x = logits_ref[...]                # (tb, tc) input dtype
    lab = labels_ref[...]              # (tb, 1)  i32; -1 => no target column
    tgt = target_ref[...]              # (tb, 1)  f32; s*cos(arccos(x_t) + margin)

    # Tile-local label: one (tb,1) subtract instead of a (tb,tc) integer add.
    lab_local = lab - pl.program_id(1) * tc
    iota = lax.broadcasted_iota(jnp.int32, x.shape, 1)
    is_target = iota == lab_local      # -1 labels (and padded rows) never match

    out = x.astype(jnp.float32) * s
    out = jnp.where(is_target, tgt, out)
    out_ref[...] = out.astype(out_ref.dtype)


def _round_up(x, m):
    return ((x + m - 1) // m) * m


def _choose_tile(dim, target, unit):
    """Return (tile, padded_dim).

    tile is a multiple of `unit`, <= target, and divides padded_dim; padded_dim
    >= dim.  Prefers a large divisor of the unit-rounded dim (no padding waste);
    otherwise pads up to a multiple of the target tile instead of silently
    falling back to the full dimension (which could blow past VMEM).
    """
    target = max(unit, (target // unit) * unit)
    padded = _round_up(dim, unit)
    if padded <= target:
        return padded, padded
    floor = max(unit, (max(target // 8, unit) // unit) * unit)
    t = target
    while t >= floor:
        if padded % t == 0:
            return t, padded
        t -= unit
    return target, _round_up(padded, target)


def elastic_arc(logits, labels, key, *, s, mean, sigma, tb=512, tc=4096):
    """ElasticARC forward. logits: [B, C] (f32 or bf16); labels: i32[B], -1 = ignore."""
    B, C = logits.shape
    dtype = logits.dtype

    # ---- Per-row precompute (B values, plain JAX) ---------------------------
    elastic = mean + sigma * jax.random.normal(key, (B,), dtype=jnp.float32)
    margin = jnp.where(labels != -1, elastic, 0.0)
    safe_lab = jnp.clip(labels, 0, C - 1).astype(jnp.int32)
    xt = jnp.take_along_axis(logits.astype(jnp.float32), safe_lab[:, None], axis=1)[:, 0]
    xt = jnp.clip(xt, -1.0, 1.0)                       # match clip-before-arccos
    target_val = s * jnp.cos(jnp.arccos(xt) + margin)  # scale s folded in
    labels2d = labels.reshape(B, 1).astype(jnp.int32)
    target2d = target_val.reshape(B, 1).astype(jnp.float32)

    # ---- Tiling: dtype-aware sublane unit, pad awkward shapes ---------------
    unit_b = 16 if dtype == jnp.bfloat16 else 8
    tb, Bp = _choose_tile(B, tb, unit_b)
    tc, Cp = _choose_tile(C, tc, 128)

    x = logits
    if (Bp, Cp) != (B, C):
        x = jnp.pad(logits, ((0, Bp - B), (0, Cp - C)))
    if Bp != B:
        labels2d = jnp.concatenate(
            [labels2d, jnp.full((Bp - B, 1), -1, jnp.int32)], axis=0)
        target2d = jnp.concatenate(
            [target2d, jnp.zeros((Bp - B, 1), jnp.float32)], axis=0)

    grid = (Bp // tb, Cp // tc)

    # Double-buffered footprint of the big blocks (+ small side blocks/headroom).
    isz = jnp.dtype(dtype).itemsize
    block_bytes = tb * tc * isz * 2            # logits in + out per grid step
    vmem_limit = int(2 * block_bytes + (4 << 20))

    # Megacore / multi-TC sharding: only CORE_PARALLEL changes how the grid is
    # split across TensorCores (v7x has 2 TCs); "parallel" suffices on 1-TC chips.
    _parallel = getattr(pltpu, "PARALLEL", "parallel")
    _core_parallel = getattr(pltpu, "CORE_PARALLEL", _parallel)
    kind = jax.devices()[0].device_kind.lower()
    dim_sems = (_core_parallel if "v7" in kind else _parallel, _parallel)

    kernel = functools.partial(elastic_arc_kernel, s=float(s), tc=tc)

    out = pl.pallas_call(
        kernel,
        out_shape=jax.ShapeDtypeStruct((Bp, Cp), dtype),
        grid_spec=pltpu.PrefetchScalarGridSpec(
            num_scalar_prefetch=0,
            grid=grid,
            in_specs=[
                pl.BlockSpec((tb, tc), lambda i, j: (i, j)),  # logits tile
                pl.BlockSpec((tb, 1), lambda i, j: (i, 0)),   # labels
                pl.BlockSpec((tb, 1), lambda i, j: (i, 0)),   # s*cos(theta_t + m)
            ],
            out_specs=pl.BlockSpec((tb, tc), lambda i, j: (i, j)),
        ),
        compiler_params=pltpu.CompilerParams(
            dimension_semantics=dim_sems,
            vmem_limit_bytes=vmem_limit,
        ),
    )(x, labels2d, target2d)

    if (Bp, Cp) != (B, C):
        out = out[:B, :C]
    return out


def elastic_arc_reference(logits, labels, key, *, s, mean, sigma):
    """Pure-JAX reference (same noise draw as the kernel wrapper)."""
    B, C = logits.shape
    elastic = mean + sigma * jax.random.normal(key, (B,), dtype=jnp.float32)
    margin = jnp.where(labels != -1, elastic, 0.0)
    col = jnp.arange(C, dtype=jnp.int32)[None, :]
    is_target = col == labels[:, None]
    x = logits.astype(jnp.float32)
    shifted = jnp.cos(jnp.arccos(jnp.clip(x, -1.0, 1.0)) + margin[:, None])
    return (jnp.where(is_target, shifted, x) * s).astype(logits.dtype)


if __name__ == "__main__":
    # ElasticARC(parameters=[s, mean, sigma])
    S, MEAN, SIGMA = 64.0, 0.0, 0.05
    root = jax.random.PRNGKey(0)

    # (B, C, dtype, tb, tc, atol): small shapes, but exercising multi-tile
    # column offsets, the padding path, and bf16 I/O with a 16-row sublane tile.
    cases = [
        (16, 384, jnp.float32, 8, 128, 1e-3),    # 2 x 3 grid: multi-tile labels
        (12, 300, jnp.float32, 8, 128, 1e-3),    # non-divisible B and C -> padded
        (32, 256, jnp.bfloat16, 16, 128, 0.5),   # bf16 I/O, dtype-aware tiling
    ]

    for idx, (B, C, dtype, tb, tc, atol) in enumerate(cases):
        k_logits, k_labels, k_noise = jax.random.split(jax.random.fold_in(root, idx), 3)
        logits = jax.random.uniform(k_logits, (B, C), dtype=jnp.float32,
                                    minval=-0.95, maxval=0.95).astype(dtype)
        labels = jax.random.randint(k_labels, (B,), 0, C, dtype=jnp.int32)
        labels = labels.at[1].set(-1).at[5].set(-1)   # some ignored rows

        out = elastic_arc(logits, labels, k_noise, s=S, mean=MEAN, sigma=SIGMA,
                          tb=tb, tc=tc)
        out = jax.block_until_ready(out)
        ref = elastic_arc_reference(logits, labels, k_noise, s=S, mean=MEAN, sigma=SIGMA)

        assert out.shape == (B, C) and out.dtype == dtype
        err = float(jnp.max(jnp.abs(out.astype(jnp.float32) - ref.astype(jnp.float32))))
        assert err < atol, f"case {idx}: max abs err {err} >= {atol}"

    print("KERNEL_OK")
</pallas_src>

<mosaic_0001>
module attributes {stable_mosaic.version = 11 : i64} {
  func.func @elastic_arc_kernel(%arg0: i32, %arg1: i32, %arg2: memref<8x128xf32, #tpu.memory_space<vmem>>, %arg3: memref<8x1xi32, #tpu.memory_space<vmem>>, %arg4: memref<8x1xf32, #tpu.memory_space<vmem>>, %arg5: memref<8x128xf32, #tpu.memory_space<vmem>>) attributes {dimension_semantics = [#tpu.dimension_semantics<parallel>, #tpu.dimension_semantics<parallel>], iteration_bounds = array<i64: 2, 3>, scalar_prefetch = 0 : i64, scratch_operands = 0 : i64, tpu.core_type = #tpu.core_type<tc>, window_params = [{transform_indices = @transform_0, window_bounds = array<i64: 8, 128>}, {transform_indices = @transform_1, window_bounds = array<i64: 8, 1>}, {transform_indices = @transform_2, window_bounds = array<i64: 8, 1>}, {transform_indices = @transform_3, window_bounds = array<i64: 8, 128>}]} {
    %c0 = arith.constant 0 : index
    %c0_0 = arith.constant 0 : index
    %0 = vector.load %arg2[%c0, %c0_0] : memref<8x128xf32, #tpu.memory_space<vmem>>, vector<8x128xf32>
    %c0_1 = arith.constant 0 : index
    %c0_2 = arith.constant 0 : index
    %1 = vector.load %arg3[%c0_1, %c0_2] : memref<8x1xi32, #tpu.memory_space<vmem>>, vector<8x1xi32>
    %c0_3 = arith.constant 0 : index
    %c0_4 = arith.constant 0 : index
    %2 = vector.load %arg4[%c0_3, %c0_4] : memref<8x1xf32, #tpu.memory_space<vmem>>, vector<8x1xf32>
    %c128_i32 = arith.constant 128 : i32
    %3 = arith.muli %arg1, %c128_i32 : i32
    %4 = vector.broadcast %3 : i32 to vector<8x1xi32>
    %5 = arith.subi %1, %4 : vector<8x1xi32>
    %6 = tpu.iota {dimensions = array<i32: 1>} : vector<8x128xi32>
    %7 = vector.broadcast %5 : vector<8x1xi32> to vector<8x128xi32>
    %8 = arith.cmpi eq, %6, %7 : vector<8x128xi32>
    %cst = arith.constant 6.400000e+01 : f32
    %9 = vector.broadcast %cst : f32 to vector<8x128xf32>
    %10 = arith.mulf %0, %9 : vector<8x128xf32>
    %11 = vector.shape_cast %2 : vector<8x1xf32> to vector<8x1xf32>
    %12 = vector.broadcast %11 : vector<8x1xf32> to vector<8x128xf32>
    %13 = arith.select %8, %12, %10 : vector<8x128xi1>, vector<8x128xf32>
    %c0_5 = arith.constant 0 : index
    %c0_6 = arith.constant 0 : index
    %14 = vector.load %arg5[%c0_5, %c0_6] : memref<8x128xf32, #tpu.memory_space<vmem>>, vector<8x128xf32>
    tpu.vector_store %arg5[%c0_5, %c0_6], %13 {strides = array<i32>} : memref<8x128xf32, #tpu.memory_space<vmem>>, vector<8x128xf32>,
    return
  }
  func.func @transform_0(%arg0: i32, %arg1: i32) -> (i32, i32) {
    %c0_i32 = arith.constant 0 : i32
    return %arg0, %arg1 : i32, i32
  }
  func.func @transform_1(%arg0: i32, %arg1: i32) -> (i32, i32) {
    %c0_i32 = arith.constant 0 : i32
    %c0_i32_0 = arith.constant 0 : i32
    return %arg0, %c0_i32 : i32, i32
  }
  func.func @transform_2(%arg0: i32, %arg1: i32) -> (i32, i32) {
    %c0_i32 = arith.constant 0 : i32
    %c0_i32_0 = arith.constant 0 : i32
    return %arg0, %c0_i32 : i32, i32
  }
  func.func @transform_3(%arg0: i32, %arg1: i32) -> (i32, i32) {
    %c0_i32 = arith.constant 0 : i32
    return %arg0, %arg1 : i32, i32
  }
}

</mosaic_0001>

<bundles_post_ra>
// kernel: tpu_custom_call.1
= control target key start
LH: loop header
LB: loop body
LE: loop exit
PB: predicated region body
PF: predicated region fallthrough
CT: control target
= control target key end

     0   :  { %8 = vsyncpa [#allocation3], 0  ;;  %s787_s0 = inlined_call_operand.hbm [shape: f32[16,384], index: 0, kind: input, shape index: {}]   ;;  %s788_s1 = inlined_call_operand.vmem [shape: s32[16,1], index: 1, kind: input, shape index: {}]   ;;  %s789_s2 = inlined_call_operand.vmem [shape: f32[16,1], index: 2, kind: input, shape index: {}]   ;;  %s790_s3 = inlined_call_operand.hbm [shape: f32[16,384], index: 3, kind: output, shape index: {}]  }
   0x1   :  { %10 = vsyncpa [#allocation3 + $0x1], 0 }
   0x2   :  { %11 = vsyncpa [#allocation4], 0 }
   0x3   :  { %13 = vsyncpa [#allocation4 + $0x1], 0  ;;  %s636_s12 = smov 0   ;;  %s638_s13 = smov 0  }
   0x4   :  { %s640_s14 = smov 0   ;;  %s642_s15 = smov 0  }
   0x5   :  { %s644_s16 = smov 0   ;;  %s646_s17 = smov 0  }
   0x6   :  { %s648_s18 = smov 0   ;;  %s650_s19 = smov 0  }
   0x7 LB: > { %s387_s20 = sadd.s32 4294967295, %s613_s19   ;;  %s388_s21 = sadd.s32 4294967294, %s613_s19   ;;  %s613_s19 = sphi %s650_s19, %s19_s19   ;;  %s609_s18 = sphi %s648_s18, %s804_s18   ;;  %s605_s17 = sphi %s646_s17, %s803_s17   ;;  %s601_s16 = sphi %s644_s16, %s802_s16   ;;  %s597_s15 = sphi %s642_s15, %s801_s15   ;;  %s593_s14 = sphi %s640_s14, %s800_s14   ;;  %s589_s13 = sphi %s638_s13, %s799_s13   ;;  %s585_s12 = sphi %s636_s12, %s798_s12  }
   0x8   : > { %s28_s22 = sadd.s32 1, %s605_s17  ;;  %s31_s23 = sadd.s32 1, %s609_s18 }
   0x9   : > { %p29_p0 = scmp.ge.s32.totalorder %s28_s22, 3  ;;  %s40_s24 = sadd.s32 1, %s593_s14 }
   0xa   : > { %p47_p1 = scmp.ne.s32.totalorder %s593_s14, %s589_s13  ;;  %p48_p2 = scmp.eq.s32.totalorder %s613_s19, 0 }
   0xb   : > { %s806_s22 = smov (%p29_p0, %s28_s22), 0  ;;  %s808_s23 = smov (!%p29_p0, %s31_s23), %s609_s18 }
   0xc   : > { %s36_s25 = ssub.s32 %s605_s17, %s806_s22  ;;  %p689_p3 = por %p48_p2, %p47_p1 }
   0xd   : > { %p33_p4 = scmp.ge.s32.totalorder %s808_s23, 2  ;;  %p53_p5 = scmp.ne.s32.totalorder %s589_s13, %s585_s12 }
   0xe   : > { %p54_p6 = scmp.eq.s32.totalorder %s387_s20, 0  ;;  %p131_p7 = scmp.eq.s32.totalorder %s387_s20, 5 }
   0xf   : > { %s810_s23 = smov (%p33_p4, %s808_s23), 0  ;;  %p137_p10 = scmp.eq.s32.totalorder %s388_s21, 5 }
  0x10   : > { %793 = sst [smem:[#allocation8_spill]] %s810_s23  ;;  %p697_p8 = por %p54_p6, %p53_p5 }
  0x11   : > { %p701_p9 = por %p131_p7, %p47_p1  ;;  %s35_s29 = ssub.s32 %s609_s18, %s810_s23 }
  0x12   : > { %s37_s30 = sor.u32 %s36_s25, %s35_s29  ;;  %p707_p12 = por %p137_p10, %p53_p5 }
  0x13   : > { %p38_p11 = scmp.eq.s32.totalorder %s37_s30, 0  ;;  %p417_p13 = scmp.lt.s32.totalorder %s613_s19, 6 }
  0x14   : > { %s157_s5 = sand.u32 1, %s593_s14   ;;  %s403_s8 = smul.u32 3, %s609_s18 }
  0x15   : > { %s714_s6 = scalar_select %p38_p11, %s593_s14, %s40_s24  }
  0x16   : > { %s391_s7 = sshll.u32 %s157_s5, 3  ;;  %p410_p0 = pnand %p417_p13, %p689_p3 }
  0x17   : > { %s161_s9 = scalar_lea.vmem [#allocation2], %s391_s7  ;;  %s165_s11 = sadd.s32 %s605_s17, %s403_s8 }
  0x18   : > { %s171_s10 = sshll.u32 %s161_s9, 4  ;;  %s392_s20 = sshll.u32 %s165_s11, 3  ;;  %s172_s10 = int_to_ptr.vmem [resolvable:$true] %s171_s10 }
  0x19   : > { %s167_s29 = scalar_lea.hbm %s787_s0, %s392_s20  ;;  %p393_p1 = scmp.ge.s32.totalorder %s613_s19, 1 }
  0x1a   : > { %s169_s30 = sshll.u32 %s167_s29, 4  ;;  %p190_p2 = scmp.lt.s32.totalorder %s613_s19, 7  ;;  %s170_s30 = int_to_ptr.hbm [resolvable:$true] %s169_s30 }
  0x1b   : > { %s158_s23 = scalar_lea.sflag [#allocation3], %s157_s5 }
  0x1c   : > { %412 = dma.hbm_to_vmem [thread:$0]  (!%p410_p0), %s170_s30, 128, %s172_s10, %s158_s23  }
  0x1d   : > { %p191_p4 = pnand %p393_p1, %p190_p2 }
  0x1e   : > { %s726_s24 = sand.u32 (!%p191_p4), 1, %s589_s13  }
  0x1f   : > { %194 = sbr.rel (%p191_p4) target bundleno = 173 (0xad), region = 32  ;;  %s394_s26 = sshll.u32 (!%p191_p4), %s726_s24, 3 }
  0x20   : > { %s197_s7 = scalar_lea.sflag (!%p191_p4), [#allocation3], %s726_s24  ;;  %s200_s8 = scalar_lea.vmem (!%p191_p4), [#allocation2], %s394_s26 }
  0x24   : > { %576 = dma.done.wait (%p697_p8), %s197_s7, 128  }
  0x25   : > { %578 = vsyncadd (%p697_p8), %s197_s7, 4294967168  ;;  %p232_p3 = scmp.lt.s32.totalorder %s601_s16, 1  ;;  %v615_v0 = vmov 0   ;;  %s398_s23 = sshll.u32 %s597_s15, 7  ;;  %v246_v5 = vlaneseq  ;;  %v240_v7 = vld [vmem:[%s200_s8] sm:$0xff] }
  0x26   : > { %484 = vset.pattern.permute.xlu0 %v615_v0  ;;  %v244_v1 = vstv %s398_s23  ;;  %s404_s29 = smul.u32 3, %s601_s16  ;;  %v252_v9 = vmul.f32 64.0, %v240_v7  ;;  %s231_s11 = scalar_lea.vmem [#allocation5], %s394_s26 }
  0x27   : > { %s233_s5 = scalar_select %p232_p3, %s601_s16, 1  ;;  %v247_v8 = vand.u32 127, %v246_v5 }
  0x28   : > { %s271_s30 = sadd.s32 %s597_s15, %s404_s29  ;;  %s261_s15 = scalar_lea.sflag [#allocation4], %s726_s24 }
  0x29   : > { %s396_s9 = sshll.u32 %s233_s5, 3  ;;  %s400_s7 = sshll.u32 %s271_s30, 3 }
  0x2a   : > { %s235_s20 = scalar_lea.vmem %s788_s1, %s396_s9  ;;  %s239_s25 = scalar_lea.vmem %s789_s2, %s396_s9 }
  0x2b   : > { %v241_v2 = vld [vmem:[%s235_s20] sm:$0xff]  ;;  %s273_s23 = scalar_lea.hbm %s790_s3, %s400_s7  ;;  %s275_s20 = sshll.u32 %s231_s11, 4  ;;  %s276_s20 = int_to_ptr.vmem [resolvable:$true] %s275_s20 }
  0x2c   : > { %v245_v3 = vsub.s32 %v241_v2, %v244_v1  ;;  %v242_v4 = vld [vmem:[%s239_s25] sm:$0xff]  ;;  %s277_s27 = sshll.u32 %s273_s23, 4  ;;  %s535_s26 = scalar_lea.hbm %s790_s3, 48  ;;  %s278_s27 = int_to_ptr.hbm [resolvable:$true] %s277_s27 }
  0x2d   : > { %s529_s16 = sshra.s32 %s278_s27, 4  ;;  %s530_s16 = int_to_ptr.hbm [resolvable:$true] %s529_s16 }
  0x2e   : > { %249 = vperm.xlu0 %484, %v245_v3   ;;  %s531_s8 = scalar_lea.hbm %s530_s16, 8  ;;  %p536_p8 = scmp.lt.s32.totalorder %s530_s16, %s790_s3 }
  0x2f   : > { %p532_p5 = scmp.ne.s32.totalorder %s530_s16, %s531_s8  ;;  %p537_p10 = scmp.lt.s32.totalorder %s535_s26, %s531_s8 }
  0x31   : > { %p533_p6 = pnand %p532_p5, %p701_p9  ;;  %p538_p11 = por %p537_p10, %p536_p8 }
  0x33   : > { %p534_p7 = pneg %p533_p6 }
  0x35   : > { %p539_p13 = pnand %p538_p11, %p534_p7 }
  0x36   : > { %255 = vperm.xlu0 %484, %v242_v4  }
  0xa0   : > { %v250_v6 = vpop.permute.xlu0 %249 }
  0xa1   : > { %vm251_vm0 = vcmp.eq.s32.totalorder %v247_v8, %v250_v6 }
  0xa8   : > { %v256_v10 = vpop.permute.xlu0 %255 }
  0xa9   : > { %v258_v11 = vsel %vm251_vm0, %v256_v10, %v252_v9 }
  0xaa   : > { %259 = vst [vmem:[%s231_s11] sm:$0xff] %v258_v11 }
  0xab   : > { %542 = shalt.err (!%p539_p13)
}
  0xac   : > { %407 = dma.vmem_to_hbm [thread:$0]  (%p701_p9), %s276_s20, 128, %s278_s27, %s261_s15  }
  0xad PF: > { %p418_p0 = scmp.ge.s32.totalorder %s613_s19, 2  ;;  %s289_s24 = sand.u32 1, %s585_s12  }
  0xae   : > { %s290_s30 = scalar_lea.sflag [#allocation4], %s289_s24 }
  0xaf   : > { %p414_p1 = pnand %p418_p0, %p707_p12 }
  0xb1   : > { %p415_p2 = pneg %p414_p1 }
  0xb3   : > { %580 = dma.done.wait (%p415_p2), %s290_s30, 128  }
  0xb4   : > { %582 = vsyncadd (%p415_p2), %s290_s30, 4294967168  ;;  %s19_s19 = sadd.s32 1, %s613_s19   ;;  %s797_s28 = sld [smem:[#allocation8_spill]] }
  0xb5   : > { %p16_p4 = scmp.ge.s32.totalorder %s19_s19, 8   ;;  %s798_s12 = smov %s589_s13 }
  0xb6   : > { %s799_s13 = smov %s593_s14  ;;  %s800_s14 = smov %s714_s6 }
  0xb7   : > { %s801_s15 = smov %s605_s17  ;;  %s802_s16 = smov %s609_s18 }
  0xb8   : > { %s803_s17 = smov %s806_s22  ;;  %18 = sbr.rel (!%p16_p4) target bundleno = 7 (0x7), region = 83 }
  0xba   : > { %s804_s18 = smov %s797_s28 }
  0xbd   :  { %296 = vsyncpa [#allocation3], 1 }
  0xbe   :  { %298 = vsyncpa [#allocation3 + $0x1], 1 }
  0xbf   :  { %299 = vsyncpa [#allocation4], 1 }
  0xc0   :  { %301 = vsyncpa [#allocation4 + $0x1], 1 }

</bundles_post_ra>
